<compile_context>
chip_gen: v7x
topology: tpu7x:2x2x1
jax: 0.10.0
libtpu: 0.0.40
codegen_flags: <defaults>
</compile_context>

<pallas_src>
import functools

import jax
import jax.numpy as jnp
from jax import lax
from jax.experimental import pallas as pl
from jax.experimental.pallas import tpu as pltpu


def fm_kernel(w0_ref, x_ref, wt_ref, w2sq_t_ref, o_ref, *, emb_dim):
    x = x_ref[...]            # (TM, F)   batch on sublanes, features on lanes
    w_t = wt_ref[...]         # (D+1, F)  rows 0..D-1 = w2^T, row D = w1^T
    w2sq_t = w2sq_t_ref[...]  # (D, F)    (w2*w2)^T

    # Contract the feature axis of both operands ('dk,nk->dn'), so the
    # result has batch on the lane axis (lane-dense all the way to the store).
    dn = (((1,), (1,)), ((), ()))
    xw_t = lax.dot_general(w_t, x, dn,
                           preferred_element_type=jnp.float32)       # (D+1, TM)
    x2w2_t = lax.dot_general(w2sq_t, x * x, dn,
                             preferred_element_type=jnp.float32)     # (D, TM)

    xw2_t = xw_t[:emb_dim, :]       # (D, TM) == (x @ w2)^T
    first_t = xw_t[emb_dim:, :]     # (1, TM) == (x @ w1)^T

    second_t = 0.5 * jnp.sum(xw2_t * xw2_t - x2w2_t,
                             axis=0, keepdims=True)                  # (1, TM)

    o_ref[...] = w0_ref[0] + first_t + second_t                      # (1, TM)


def _pick_batch_tile(batch, feat):
    # Largest lane-aligned tile that divides the batch and keeps the
    # double-buffered x tile comfortably inside scoped VMEM (v5e: 16 MiB).
    for tm in (4096, 2048, 1024, 512, 256, 128):
        if batch % tm == 0 and tm * feat * 4 <= 2 * 1024 * 1024:
            return tm
    return batch  # small / odd batch: single whole-batch block


def fm_forward(x, w0, w1, w2, *, tm=None):
    batch, feat = x.shape
    emb_dim = w2.shape[1]

    # Loop-invariant weight prep, done once outside the grid:
    #   fused weight [w2 | w1]^T -> (D+1, F),  squared (w2*w2)^T -> (D, F).
    w_t = jnp.concatenate([w2, w1], axis=1).T.astype(jnp.float32)
    w2sq_t = (w2 * w2).T.astype(jnp.float32)

    if tm is None:
        tm = _pick_batch_tile(batch, feat)
    if batch % tm != 0:
        raise ValueError(f"batch {batch} not divisible by tile {tm}")
    grid = (batch // tm,)

    out = pl.pallas_call(
        functools.partial(fm_kernel, emb_dim=emb_dim),
        out_shape=jax.ShapeDtypeStruct((1, batch), jnp.float32),
        grid=grid,
        in_specs=[
            pl.BlockSpec(memory_space=pltpu.SMEM),                 # w0 scalar
            pl.BlockSpec((tm, feat), lambda i: (i, 0)),            # x tile
            pl.BlockSpec((emb_dim + 1, feat), lambda i: (0, 0)),   # [w2|w1]^T
            pl.BlockSpec((emb_dim, feat), lambda i: (0, 0)),       # (w2^2)^T
        ],
        out_specs=pl.BlockSpec((1, tm), lambda i: (0, i)),         # lane-dense
        compiler_params=pltpu.CompilerParams(
            dimension_semantics=("parallel",)),
    )(w0, x, w_t, w2sq_t)

    return out.reshape(batch, 1)


def fm_reference(x, w0, w1, w2):
    first = x @ w1
    second = 0.5 * jnp.sum((x @ w2) ** 2 - (x ** 2) @ (w2 ** 2),
                           axis=1, keepdims=True)
    return w0[0] + first + second


if __name__ == "__main__":
    num_embeddings = 32
    embedding_dim = 16

    key = jax.random.PRNGKey(0)
    kx1, kx2, k1, k2 = jax.random.split(key, 4)

    # Deterministic parameter init mirroring the module's __init__:
    #   w0 = zeros([1]); w1, w2 Xavier-normal.
    w0 = jnp.zeros((1,), dtype=jnp.float32)
    std1 = (2.0 / (num_embeddings + 1)) ** 0.5
    std2 = (2.0 / (num_embeddings + embedding_dim)) ** 0.5
    w1 = std1 * jax.random.normal(k1, (num_embeddings, 1), dtype=jnp.float32)
    w2 = std2 * jax.random.normal(k2, (num_embeddings, embedding_dim),
                                  dtype=jnp.float32)

    # batch=8 exercises the whole-array single-block path; batch=256 with
    # tm=128 exercises the tiled, pipelined multi-step grid path.
    for kx, batch, tm in ((kx1, 8, None), (kx2, 256, 128)):
        x = jax.random.normal(kx, (batch, num_embeddings), dtype=jnp.float32)
        out = jax.block_until_ready(fm_forward(x, w0, w1, w2, tm=tm))
        ref = fm_reference(x, w0, w1, w2)
        assert out.shape == (batch, 1)
        assert jnp.allclose(out, ref, atol=1e-4, rtol=1e-4), (batch, out, ref)

    print("KERNEL_OK")
</pallas_src>

<mosaic_0001>
module attributes {stable_mosaic.version = 11 : i64} {
  func.func @fm_kernel(%arg0: i32, %arg1: memref<1xf32, #tpu.memory_space<smem>>, %arg2: memref<8x32xf32, #tpu.memory_space<vmem>>, %arg3: memref<17x32xf32, #tpu.memory_space<vmem>>, %arg4: memref<16x32xf32, #tpu.memory_space<vmem>>, %arg5: memref<1x8xf32, #tpu.memory_space<vmem>>) attributes {dimension_semantics = [#tpu.dimension_semantics<parallel>], iteration_bounds = array<i64: 1>, scalar_prefetch = 0 : i64, scratch_operands = 0 : i64, tpu.core_type = #tpu.core_type<tc>, window_params = [{transform_indices = @transform_0, window_bounds = array<i64: 1>}, {transform_indices = @transform_1, window_bounds = array<i64: 8, 32>}, {pipeline_mode = #tpu.pipeline_mode<synchronous>, transform_indices = @transform_2, window_bounds = array<i64: 17, 32>}, {pipeline_mode = #tpu.pipeline_mode<synchronous>, transform_indices = @transform_3, window_bounds = array<i64: 16, 32>}, {transform_indices = @transform_4, window_bounds = array<i64: 1, 8>}]} {
    %c0 = arith.constant 0 : index
    %c0_0 = arith.constant 0 : index
    %0 = vector.load %arg2[%c0, %c0_0] : memref<8x32xf32, #tpu.memory_space<vmem>>, vector<8x32xf32>
    %c0_1 = arith.constant 0 : index
    %c0_2 = arith.constant 0 : index
    %1 = vector.load %arg3[%c0_1, %c0_2] : memref<17x32xf32, #tpu.memory_space<vmem>>, vector<17x32xf32>
    %c0_3 = arith.constant 0 : index
    %c0_4 = arith.constant 0 : index
    %2 = vector.load %arg4[%c0_3, %c0_4] : memref<16x32xf32, #tpu.memory_space<vmem>>, vector<16x32xf32>
    %cst = arith.constant dense<0.000000e+00> : vector<17x8xf32>
    %3 = tpu.matmul %1, %0, %cst {dimension_numbers = #tpu.dot_dimension_numbers<[1], [1], [0], [0], [0, 0, 1, 0], [], []>} : vector<17x32xf32>, vector<8x32xf32>, vector<17x8xf32> -> vector<17x8xf32>
    %4 = arith.mulf %0, %0 : vector<8x32xf32>
    %cst_5 = arith.constant dense<0.000000e+00> : vector<16x8xf32>
    %5 = tpu.matmul %2, %4, %cst_5 {dimension_numbers = #tpu.dot_dimension_numbers<[1], [1], [0], [0], [0, 0, 1, 0], [], []>} : vector<16x32xf32>, vector<8x32xf32>, vector<16x8xf32> -> vector<16x8xf32>
    %6 = vector.extract_strided_slice %3 {offsets = [0, 0], sizes = [16, 8], strides = [1, 1]} : vector<17x8xf32> to vector<16x8xf32>
    %7 = vector.extract_strided_slice %3 {offsets = [16, 0], sizes = [1, 8], strides = [1, 1]} : vector<17x8xf32> to vector<1x8xf32>
    %8 = arith.mulf %6, %6 : vector<16x8xf32>
    %9 = arith.subf %8, %5 : vector<16x8xf32>
    %cst_6 = arith.constant dense<0.000000e+00> : vector<8xf32>
    %10 = vector.multi_reduction <add>, %9, %cst_6 [0] : vector<16x8xf32> to vector<8xf32>
    %11 = vector.shape_cast %10 : vector<8xf32> to vector<1x8xf32>
    %cst_7 = arith.constant 5.000000e-01 : f32
    %12 = vector.broadcast %cst_7 : f32 to vector<1x8xf32>
    %13 = arith.mulf %12, %11 : vector<1x8xf32>
    %c0_8 = arith.constant 0 : index
    %14 = memref.load %arg1[%c0_8] : memref<1xf32, #tpu.memory_space<smem>>
    %15 = vector.broadcast %14 : f32 to vector<1x8xf32>
    %16 = arith.addf %15, %7 : vector<1x8xf32>
    %17 = arith.addf %16, %13 : vector<1x8xf32>
    %c0_9 = arith.constant 0 : index
    %c0_10 = arith.constant 0 : index
    %18 = vector.load %arg5[%c0_9, %c0_10] : memref<1x8xf32, #tpu.memory_space<vmem>>, vector<1x8xf32>
    tpu.vector_store %arg5[%c0_9, %c0_10], %17 {strides = array<i32>} : memref<1x8xf32, #tpu.memory_space<vmem>>, vector<1x8xf32>,
    return
  }
  func.func @transform_0(%arg0: i32) -> i32 {
    %c0_i32 = arith.constant 0 : i32
    %c0_i32_0 = arith.constant 0 : i32
    return %c0_i32 : i32
  }
  func.func @transform_1(%arg0: i32) -> (i32, i32) {
    %c0_i32 = arith.constant 0 : i32
    %c0_i32_0 = arith.constant 0 : i32
    return %arg0, %c0_i32 : i32, i32
  }
  func.func @transform_2(%arg0: i32) -> (i32, i32) {
    %c0_i32 = arith.constant 0 : i32
    %c0_i32_0 = arith.constant 0 : i32
    %c0_i32_1 = arith.constant 0 : i32
    return %c0_i32, %c0_i32_0 : i32, i32
  }
  func.func @transform_3(%arg0: i32) -> (i32, i32) {
    %c0_i32 = arith.constant 0 : i32
    %c0_i32_0 = arith.constant 0 : i32
    %c0_i32_1 = arith.constant 0 : i32
    return %c0_i32, %c0_i32_0 : i32, i32
  }
  func.func @transform_4(%arg0: i32) -> (i32, i32) {
    %c0_i32 = arith.constant 0 : i32
    %c0_i32_0 = arith.constant 0 : i32
    return %c0_i32, %arg0 : i32, i32
  }
}

</mosaic_0001>

<bundles_post_ra>
// kernel: tpu_custom_call.1
= control target key start
LH: loop header
LB: loop body
LE: loop exit
PB: predicated region body
PF: predicated region fallthrough
CT: control target
= control target key end

     0   :  { %10 = vsyncpa [#allocation4], 0  ;;  %s512_s0 = inlined_call_operand.<no memory space> [shape: f32[1], index: 0, kind: input, shape index: {}]   ;;  %s513_s1 = inlined_call_operand.hbm [shape: f32[8,32], index: 1, kind: input, shape index: {}]   ;;  %s514_s2 = inlined_call_operand.hbm [shape: f32[17,32], index: 2, kind: input, shape index: {}]   ;;  %s515_s3 = inlined_call_operand.hbm [shape: f32[16,32], index: 3, kind: input, shape index: {}]   ;;  %s516_s4 = inlined_call_operand.hbm [shape: f32[1,8], index: 4, kind: output, shape index: {}]  }
   0x1   :  { %11 = vsyncpa [#allocation7], 0 }
   0x2   :  { %12 = vsyncpa [#allocation5], 0  ;;  %s413_s15 = smov [#allocation6]   ;;  %s319_s19 = scalar_lea.hbm %s514_s2, 384 }
   0x3   :  { %s30_s16 = sshll.u32 %s413_s15, 4  ;;  %p320_p0 = scmp.ne.s32.totalorder %s514_s2, %s319_s19  ;;  %s31_s16 = int_to_ptr.vmem [resolvable:$true] %s30_s16 }
   0x4   :  { %p323_p1 = scmp.lt.u32.totalorder %s319_s19, %s514_s2 }
   0x6   :  { %p325_p2 = pnand %p323_p1, %p320_p0 }
   0x8   :  { %328 = shalt.err (!%p325_p2)
}
   0x9   :  { %s329_s24 = scalar_lea.vmem %s31_s16, 384  ;;  %p334_p4 = scmp.lt.s32.totalorder %s31_s16, %s31_s16 }
   0xa   :  { %p330_p3 = scmp.ne.s32.totalorder %s31_s16, %s329_s24  ;;  %p335_p5 = scmp.lt.s32.totalorder %s329_s24, %s329_s24 }
   0xc   :  { %p336_p6 = por %p335_p5, %p334_p4 }
   0xe   :  { %p337_p7 = pnand %p336_p6, %p330_p3 }
  0x10   :  { %340 = shalt.err (!%p337_p7)
}
  0x11   :  { %s414_s25 = smov 128   ;;  %s415_s26 = smov 8  }
  0x12   :  { %36 = dma.hbm_to_vmem [thread:$0]  %s514_s2, 384, %s31_s16, [#allocation7], %s414_s25, %s414_s25, %s415_s26  }
  0x13   :  { %s416_s29 = smov [#allocation3]   ;;  %s417_s5 = smov [#allocation8]  }
  0x14   :  { %s21_s30 = sshll.u32 %s416_s29, 4  ;;  %s42_s6 = sshll.u32 %s417_s5, 4  ;;  %s22_s30 = int_to_ptr.vmem [resolvable:$true] %s21_s30  ;;  %s43_s6 = int_to_ptr.vmem [resolvable:$true] %s42_s6 }
  0x15   :  { %s341_s9 = scalar_lea.hbm %s513_s1, 128 }
  0x16   :  { %p342_p8 = scmp.ne.s32.totalorder %s513_s1, %s341_s9  ;;  %p345_p9 = scmp.lt.u32.totalorder %s341_s9, %s513_s1 }
  0x18   :  { %p347_p10 = pnand %p345_p9, %p342_p8 }
  0x1a   :  { %350 = shalt.err (!%p347_p10)
}
  0x1b   :  { %s351_s2 = scalar_lea.vmem %s22_s30, 128  ;;  %p356_p12 = scmp.lt.s32.totalorder %s22_s30, %s22_s30 }
  0x1c   :  { %p352_p11 = scmp.ne.s32.totalorder %s22_s30, %s351_s2  ;;  %p357_p13 = scmp.lt.s32.totalorder %s351_s2, %s351_s2 }
  0x1e   :  { %p358_p0 = por %p357_p13, %p356_p12 }
  0x20   :  { %p359_p1 = pnand %p358_p0, %p352_p11 }
  0x22   :  { %362 = shalt.err (!%p359_p1)
}
  0x23   :  { %24 = dma.hbm_to_vmem [thread:$0]  %s513_s1, 128, %s22_s30, [#allocation4]  }
  0x24   :  { %s363_s18 = scalar_lea.hbm %s515_s3, 256 }
  0x25   :  { %p364_p2 = scmp.ne.s32.totalorder %s515_s3, %s363_s18  ;;  %p367_p3 = scmp.lt.u32.totalorder %s363_s18, %s515_s3 }
  0x27   :  { %p369_p4 = pnand %p367_p3, %p364_p2 }
  0x29   :  { %372 = shalt.err (!%p369_p4)
}
  0x2a   :  { %s373_s23 = scalar_lea.vmem %s43_s6, 256  ;;  %p378_p6 = scmp.lt.s32.totalorder %s43_s6, %s43_s6 }
  0x2b   :  { %p374_p5 = scmp.ne.s32.totalorder %s43_s6, %s373_s23  ;;  %p379_p7 = scmp.lt.s32.totalorder %s373_s23, %s373_s23 }
  0x2d   :  { %p380_p8 = por %p379_p7, %p378_p6 }
  0x2f   :  { %p381_p9 = pnand %p380_p8, %p374_p5 }
  0x31   :  { %384 = shalt.err (!%p381_p9)
}
  0x32   :  { %48 = dma.hbm_to_vmem [thread:$0]  %s515_s3, 256, %s43_s6, [#allocation7], %s414_s25, %s414_s25, %s415_s26  }
  0x33   :  { %407 = dma.done.wait [#allocation4], 128  }
  0x34   :  { %408 = vsyncadd [#allocation4], 4294967168 }
  0x35   :  { %409 = dma.done.wait [#allocation7], 640  }
  0x36   :  { %410 = vsyncadd [#allocation7], 4294966656  ;;  %v418_v0 = vmov 0.0   ;;  %vm419_vm0 = vmmov 0   ;;  %vm64_vm1 = vcmask 261120   ;;  %v58_v1 = vld [vmem:[#allocation3] sm:$0xff]  ;;  %v258_v28 = vstv %s512_s0 }
  0x37   :  { %293 = vmatprep.subr.mxu0 %v418_v0  ;;  %309 = vmatprep.subr.mxu1 %v418_v0  ;;  %v157_v2 = vmul.f32 %v58_v1, %v58_v1  ;;  %v59_v3 = vld [vmem:[#allocation6] sm:$0xff]  ;;  %v61_v4 = vld [vmem:[#allocation6 + $0x10] sm:$0x1]  ;;  %v62_v5 = vld [vmem:[#allocation8] sm:$0xff]  ;;  %vm246_vm2 = vcmask 64512   ;;  %s420_s26 = smov [#allocation9]  }
  0x38   :  { %295 = vmatprep.mubr.msk.f32.mxu0 %vm419_vm0, %v418_v0  ;;  %301 = vmatprep.mubr.msk.f32.mxu1 %vm419_vm0, %v418_v0  ;;  %v60_v6 = vld [vmem:[#allocation6 + $0x8] sm:$0xff]  ;;  %v63_v7 = vld [vmem:[#allocation8 + $0x8] sm:$0xff]  ;;  %s269_s27 = sshll.u32 %s420_s26, 4  ;;  %vm261_vm3 = vcmask 57344   ;;  %s270_s27 = int_to_ptr.vmem [resolvable:$true] %s269_s27 }
  0x39   :  { %294 = vmatpush3.xpose.msk.msra.mxu0 %vm64_vm1, %v58_v1  ;;  %310 = vmatpush3.xpose.msk.msra.mxu1 %vm64_vm1, %v58_v1  ;;  %s385_s28 = scalar_lea.vmem %s270_s27, 16  ;;  %s389_s29 = scalar_lea.vmem %s270_s27, 32 }
  0x3a   :  { %304 = vmatprep.subr.msk.mxu1 %vm64_vm1, %v157_v2  ;;  %p386_p10 = scmp.ne.s32.totalorder %s270_s27, %s385_s28  ;;  %p390_p11 = scmp.lt.s32.totalorder %s270_s27, %s270_s27 }
  0x3b   :  { %p391_p12 = scmp.lt.s32.totalorder %s389_s29, %s385_s28 }
  0x3c   :  { %296 = vmatmul.mubr.msk.f32.vlgmr.msra.gmra.mrb[0].mxu0 %vm64_vm1, %v59_v3  ;;  %302 = vmatmul.mubr.msk.f32.vlgmr.msra.gmra.mrb[0].mxu1 %vm64_vm1, %v61_v4 }
  0x3d   :  { %305 = vmatpush3.xpose.msk.msra.mxu1 %vm64_vm1, %v157_v2  ;;  %298 = vmatprep.mubr.msk.f32.mxu0 %vm419_vm0, %v418_v0  ;;  %p392_p13 = por %p391_p12, %p390_p11 }
  0x3e   :  { %306 = vmatprep.mubr.msk.f32.mxu1 %vm64_vm1, %v62_v5 }
  0x3f   :  { %p393_p0 = pnand %p392_p13, %p386_p10 }
  0x40   :  { %299 = vmatmul.mubr.msk.f32.gmra.mrb[2].mxu0 %vm64_vm1, %v60_v6  ;;  %307 = vmatmul.mubr.msk.f32.vlgmr.msra.gmra.mrb[2].mxu1 %vm64_vm1, %v63_v7 }
 0x10f   :  { %v143_v8 = vpop.f32.mrb[0].mxu0  ;;  %v153_v9 = vpop.f32.mrb[0].mxu1 }
 0x110   :  { %v297_v10 = vpop.f32.mrb[1].mxu0  ;;  %v303_v11 = vpop.f32.mrb[1].mxu1  ;;  %v242_v12 = vmul.f32 %v143_v8, %v143_v8  ;;  %v259_v30 = vadd.f32 %v258_v28, %v153_v9 }
 0x113   :  { %v148_v13 = vpop.f32.mrb[2].mxu0  ;;  %v308_v14 = vpop.f32.mrb[2].mxu1 }
 0x114   :  { %v243_v15 = vmul.f32 %v148_v13, %v148_v13  ;;  %v300_v16 = vpop.f32.mrb[3].mxu0  ;;  %v233_v17 = vpop.f32.mrb[3].mxu1 }
 0x115   :  { %v244_v18 = vsub.f32 %v242_v12, %v233_v17 }
 0x116   :  { %v245_v19 = vsub.f32 %v243_v15, %v308_v14 }
 0x117   :  { %v247_v20 = vsel %vm246_vm2, %v244_v18, 0.0 }
 0x118   :  { %v248_v21 = vsel %vm246_vm2, %v245_v19, 0.0 }
 0x119   :  { %v249_v22 = vadd.f32 %v248_v21, %v247_v20 }
 0x11b   :  { %v250_v23 = vrot.slane %v249_v22, 4 }
 0x11d   :  { %v251_v24 = vadd.f32 %v250_v23, %v249_v22 }
 0x11f   :  { %v252_v25 = vrot.slane %v251_v24, 2 }
 0x121   :  { %v253_v26 = vadd.f32 %v252_v25, %v251_v24 }
 0x123   :  { %v254_v27 = vrot.slane %v253_v26, 1 }
 0x125   :  { %v255_v29 = vadd.f32 %v254_v27, %v253_v26 }
 0x127   :  { %v256_v31 = vmul.f32 0.5, %v255_v29 }
 0x129   :  { %v260_v32 = vadd.f32 %v259_v30, %v256_v31 }
 0x12b   :  { %262 = vst.msk [vmem:[#allocation9] sm:$0x1] %vm261_vm3, %v260_v32 }
 0x12c   :  { %396 = shalt.err (!%p393_p0)
}
 0x12d   :  { %s397_s0 = scalar_lea.hbm %s516_s4, 16 }
 0x12e   :  { %p398_p1 = scmp.ne.s32.totalorder %s516_s4, %s397_s0  ;;  %p401_p2 = scmp.lt.u32.totalorder %s397_s0, %s516_s4 }
 0x130   :  { %p403_p3 = pnand %p401_p2, %p398_p1 }
 0x132   :  { %406 = shalt.err (!%p403_p3)
}
 0x133   :  { %272 = dma.vmem_to_hbm [thread:$0]  %s270_s27, 16, %s516_s4, [#allocation5]  }
 0x134   :  { %411 = dma.done.wait [#allocation5], 16  }
 0x135   :  { %412 = vsyncadd [#allocation5], 4294967280 }
 0x136   :  { %276 = vsyncpa [#allocation4], 1 }
 0x137   :  { %277 = vsyncpa [#allocation7], 1 }
 0x138   :  { %278 = vsyncpa [#allocation5], 1 }

</bundles_post_ra>
